<compile_context>
chip_gen: v7x
topology: tpu7x:2x2x1
jax: 0.10.0
libtpu: 0.0.40
codegen_flags: <defaults>
</compile_context>

<pallas_src>
import jax
import jax.numpy as jnp
from jax.experimental import pallas as pl
from jax.experimental.pallas import tpu as pltpu


def linear_kernel(x_ref, w_ref, b_ref, o_ref):
    # x_ref: (K, TB) VMEM  -- batch on lanes (lane-dense loads)
    # w_ref: (K,)    SMEM  -- the Linear(10, 1) weight row, read as scalars
    # b_ref: (1,)    SMEM  -- scalar bias
    # o_ref: (1, TB) VMEM  -- lane-dense output slab (batch on lanes)
    K = x_ref.shape[0]
    # Fold the bias into the accumulator init.
    acc = jnp.full(o_ref.shape, b_ref[0], dtype=o_ref.dtype)
    # K == 10: fully unrolled scalar-from-SMEM broadcast multiply-adds (VPU).
    for k in range(K):
        acc = acc + w_ref[k] * x_ref[pl.ds(k, 1), :]
    o_ref[...] = acc


def simple_net_forward(x, w, b, *, block_b=32768):
    """y = x @ w.T + b, equivalent to nn.Linear(10, 1).forward(x).

    x: (B, K) float32
    w: (N, K) float32 with N == 1 (PyTorch Linear weight layout)
    b: (N,)   float32
    returns (B, N) float32
    """
    assert block_b % 128 == 0
    B, K = x.shape
    N, Kw = w.shape
    assert Kw == K and N == 1, "kernel is specialized for out_features == 1"

    # Lane-dense sizing: batch lives on lanes, so tiles are multiples of 128.
    B128 = pl.cdiv(B, 128) * 128
    # Cap the tile so large batches produce >= 2 grid steps (lets v7x shard
    # the 'parallel' batch axis across both TensorCores).
    if B128 >= 256:
        tb_cap = max(128, ((B128 // 2) // 128) * 128)
    else:
        tb_cap = 128
    TB = int(min(block_b, tb_cap))
    B_pad = pl.cdiv(B128, TB) * TB

    # Batch-on-lanes input layout: (K, B_pad). Ideally the producer already
    # emits x as (K, B); here the transpose and the (at most TB-1 column) pad
    # fuse into a single XLA copy.
    # TODO(synk): accept x pre-transposed as (K, B) to avoid this extra pass.
    x_t = jnp.transpose(x)
    if B_pad != B:
        x_t = jnp.pad(x_t, ((0, 0), (0, B_pad - B)))

    out = pl.pallas_call(
        linear_kernel,
        out_shape=jax.ShapeDtypeStruct((1, B_pad), x.dtype),
        grid_spec=pltpu.PrefetchScalarGridSpec(
            num_scalar_prefetch=0,
            grid=(B_pad // TB,),
            in_specs=[
                # x: (K, TB) batch tile, streamed & double-buffered by Pallas
                pl.BlockSpec((K, TB), lambda i: (0, i)),
                # weights: 10 scalars in SMEM (no VMEM stream / broadcast tile)
                pl.BlockSpec(memory_space=pltpu.MemorySpace.SMEM),
                # bias: scalar in SMEM
                pl.BlockSpec(memory_space=pltpu.MemorySpace.SMEM),
            ],
            # lane-dense output: each step writes a full (1, TB) lane slab
            out_specs=pl.BlockSpec((1, TB), lambda i: (0, i)),
        ),
        compiler_params=pltpu.CompilerParams(
            dimension_semantics=("parallel",),
        ),
        cost_estimate=pl.CostEstimate(
            flops=2 * B * K,
            transcendentals=0,
            bytes_accessed=4 * B * (K + 1) + 4 * (K + 1),
        ),
    )(x_t, w.reshape(K), b)

    return out[0, :B].reshape(B, N)


if __name__ == "__main__":
    key = jax.random.PRNGKey(0)
    k_x, k_w, k_b = jax.random.split(key, 3)

    batch, in_features, out_features = 8, 10, 1

    # Deterministic init mimicking PyTorch's default Linear init:
    # U(-1/sqrt(in_features), 1/sqrt(in_features))
    bound = 1.0 / jnp.sqrt(jnp.float32(in_features))
    w = jax.random.uniform(k_w, (out_features, in_features), jnp.float32,
                           minval=-bound, maxval=bound)
    b = jax.random.uniform(k_b, (out_features,), jnp.float32,
                           minval=-bound, maxval=bound)
    x = jax.random.normal(k_x, (batch, in_features), jnp.float32)

    y = simple_net_forward(x, w, b)
    y = jax.block_until_ready(y)

    # Reference check against plain JAX
    y_ref = x @ w.T + b
    assert y.shape == (batch, out_features)
    assert jnp.allclose(y, y_ref, atol=1e-5, rtol=1e-5)

    print("KERNEL_OK")
</pallas_src>

<mosaic_0001>
module attributes {stable_mosaic.version = 11 : i64} {
  func.func @linear_kernel(%arg0: i32, %arg1: memref<10x128xf32, #tpu.memory_space<vmem>>, %arg2: memref<10xf32, #tpu.memory_space<smem>>, %arg3: memref<1xf32, #tpu.memory_space<smem>>, %arg4: memref<1x128xf32, #tpu.memory_space<vmem>>) attributes {dimension_semantics = [#tpu.dimension_semantics<parallel>], iteration_bounds = array<i64: 1>, scalar_prefetch = 0 : i64, scratch_operands = 0 : i64, tpu.core_type = #tpu.core_type<tc>, window_params = [{transform_indices = @transform_0, window_bounds = array<i64: 10, 128>}, {transform_indices = @transform_1, window_bounds = array<i64: 10>}, {transform_indices = @transform_2, window_bounds = array<i64: 1>}, {transform_indices = @transform_3, window_bounds = array<i64: 1, 128>}]} {
    %c0 = arith.constant 0 : index
    %0 = memref.load %arg3[%c0] : memref<1xf32, #tpu.memory_space<smem>>
    %1 = vector.broadcast %0 : f32 to vector<1x128xf32>
    %c0_0 = arith.constant 0 : index
    %2 = memref.load %arg2[%c0_0] : memref<10xf32, #tpu.memory_space<smem>>
    %c0_1 = arith.constant 0 : index
    %c0_2 = arith.constant 0 : index
    %3 = vector.load %arg1[%c0_1, %c0_2] : memref<10x128xf32, #tpu.memory_space<vmem>>, vector<1x128xf32>
    %4 = vector.broadcast %2 : f32 to vector<1x128xf32>
    %5 = arith.mulf %4, %3 : vector<1x128xf32>
    %6 = arith.addf %1, %5 : vector<1x128xf32>
    %c1 = arith.constant 1 : index
    %7 = memref.load %arg2[%c1] : memref<10xf32, #tpu.memory_space<smem>>
    %c1_3 = arith.constant 1 : index
    %c0_4 = arith.constant 0 : index
    %8 = vector.load %arg1[%c1_3, %c0_4] : memref<10x128xf32, #tpu.memory_space<vmem>>, vector<1x128xf32>
    %9 = vector.broadcast %7 : f32 to vector<1x128xf32>
    %10 = arith.mulf %9, %8 : vector<1x128xf32>
    %11 = arith.addf %6, %10 : vector<1x128xf32>
    %c2 = arith.constant 2 : index
    %12 = memref.load %arg2[%c2] : memref<10xf32, #tpu.memory_space<smem>>
    %c2_5 = arith.constant 2 : index
    %c0_6 = arith.constant 0 : index
    %13 = vector.load %arg1[%c2_5, %c0_6] : memref<10x128xf32, #tpu.memory_space<vmem>>, vector<1x128xf32>
    %14 = vector.broadcast %12 : f32 to vector<1x128xf32>
    %15 = arith.mulf %14, %13 : vector<1x128xf32>
    %16 = arith.addf %11, %15 : vector<1x128xf32>
    %c3 = arith.constant 3 : index
    %17 = memref.load %arg2[%c3] : memref<10xf32, #tpu.memory_space<smem>>
    %c3_7 = arith.constant 3 : index
    %c0_8 = arith.constant 0 : index
    %18 = vector.load %arg1[%c3_7, %c0_8] : memref<10x128xf32, #tpu.memory_space<vmem>>, vector<1x128xf32>
    %19 = vector.broadcast %17 : f32 to vector<1x128xf32>
    %20 = arith.mulf %19, %18 : vector<1x128xf32>
    %21 = arith.addf %16, %20 : vector<1x128xf32>
    %c4 = arith.constant 4 : index
    %22 = memref.load %arg2[%c4] : memref<10xf32, #tpu.memory_space<smem>>
    %c4_9 = arith.constant 4 : index
    %c0_10 = arith.constant 0 : index
    %23 = vector.load %arg1[%c4_9, %c0_10] : memref<10x128xf32, #tpu.memory_space<vmem>>, vector<1x128xf32>
    %24 = vector.broadcast %22 : f32 to vector<1x128xf32>
    %25 = arith.mulf %24, %23 : vector<1x128xf32>
    %26 = arith.addf %21, %25 : vector<1x128xf32>
    %c5 = arith.constant 5 : index
    %27 = memref.load %arg2[%c5] : memref<10xf32, #tpu.memory_space<smem>>
    %c5_11 = arith.constant 5 : index
    %c0_12 = arith.constant 0 : index
    %28 = vector.load %arg1[%c5_11, %c0_12] : memref<10x128xf32, #tpu.memory_space<vmem>>, vector<1x128xf32>
    %29 = vector.broadcast %27 : f32 to vector<1x128xf32>
    %30 = arith.mulf %29, %28 : vector<1x128xf32>
    %31 = arith.addf %26, %30 : vector<1x128xf32>
    %c6 = arith.constant 6 : index
    %32 = memref.load %arg2[%c6] : memref<10xf32, #tpu.memory_space<smem>>
    %c6_13 = arith.constant 6 : index
    %c0_14 = arith.constant 0 : index
    %33 = vector.load %arg1[%c6_13, %c0_14] : memref<10x128xf32, #tpu.memory_space<vmem>>, vector<1x128xf32>
    %34 = vector.broadcast %32 : f32 to vector<1x128xf32>
    %35 = arith.mulf %34, %33 : vector<1x128xf32>
    %36 = arith.addf %31, %35 : vector<1x128xf32>
    %c7 = arith.constant 7 : index
    %37 = memref.load %arg2[%c7] : memref<10xf32, #tpu.memory_space<smem>>
    %c7_15 = arith.constant 7 : index
    %c0_16 = arith.constant 0 : index
    %38 = vector.load %arg1[%c7_15, %c0_16] : memref<10x128xf32, #tpu.memory_space<vmem>>, vector<1x128xf32>
    %39 = vector.broadcast %37 : f32 to vector<1x128xf32>
    %40 = arith.mulf %39, %38 : vector<1x128xf32>
    %41 = arith.addf %36, %40 : vector<1x128xf32>
    %c8 = arith.constant 8 : index
    %42 = memref.load %arg2[%c8] : memref<10xf32, #tpu.memory_space<smem>>
    %c8_17 = arith.constant 8 : index
    %c0_18 = arith.constant 0 : index
    %43 = vector.load %arg1[%c8_17, %c0_18] : memref<10x128xf32, #tpu.memory_space<vmem>>, vector<1x128xf32>
    %44 = vector.broadcast %42 : f32 to vector<1x128xf32>
    %45 = arith.mulf %44, %43 : vector<1x128xf32>
    %46 = arith.addf %41, %45 : vector<1x128xf32>
    %c9 = arith.constant 9 : index
    %47 = memref.load %arg2[%c9] : memref<10xf32, #tpu.memory_space<smem>>
    %c9_19 = arith.constant 9 : index
    %c0_20 = arith.constant 0 : index
    %48 = vector.load %arg1[%c9_19, %c0_20] : memref<10x128xf32, #tpu.memory_space<vmem>>, vector<1x128xf32>
    %49 = vector.broadcast %47 : f32 to vector<1x128xf32>
    %50 = arith.mulf %49, %48 : vector<1x128xf32>
    %51 = arith.addf %46, %50 : vector<1x128xf32>
    %c0_21 = arith.constant 0 : index
    %c0_22 = arith.constant 0 : index
    %52 = vector.load %arg4[%c0_21, %c0_22] : memref<1x128xf32, #tpu.memory_space<vmem>>, vector<1x128xf32>
    tpu.vector_store %arg4[%c0_21, %c0_22], %51 {strides = array<i32>} : memref<1x128xf32, #tpu.memory_space<vmem>>, vector<1x128xf32>,
    return
  }
  func.func @transform_0(%arg0: i32) -> (i32, i32) {
    %c0_i32 = arith.constant 0 : i32
    %c0_i32_0 = arith.constant 0 : i32
    return %c0_i32, %arg0 : i32, i32
  }
  func.func @transform_1(%arg0: i32) -> i32 {
    %c0_i32 = arith.constant 0 : i32
    %c0_i32_0 = arith.constant 0 : i32
    return %c0_i32 : i32
  }
  func.func @transform_2(%arg0: i32) -> i32 {
    %c0_i32 = arith.constant 0 : i32
    %c0_i32_0 = arith.constant 0 : i32
    return %c0_i32 : i32
  }
  func.func @transform_3(%arg0: i32) -> (i32, i32) {
    %c0_i32 = arith.constant 0 : i32
    %c0_i32_0 = arith.constant 0 : i32
    return %c0_i32, %arg0 : i32, i32
  }
}

</mosaic_0001>

<bundles_post_ra>
// kernel: tpu_custom_call.1
= control target key start
LH: loop header
LB: loop body
LE: loop exit
PB: predicated region body
PF: predicated region fallthrough
CT: control target
= control target key end

     0   :  { %9 = vsyncpa [#allocation4], 0  ;;  %s243_s0 = inlined_call_operand.hbm [shape: f32[10,128], index: 0, kind: input, shape index: {}]   ;;  %s244_s1 = inlined_call_operand.vmem [shape: f32[10], index: 1, kind: input, shape index: {}]   ;;  %s245_s2 = inlined_call_operand.<no memory space> [shape: f32[1], index: 2, kind: input, shape index: {}]   ;;  %s246_s3 = inlined_call_operand.hbm [shape: f32[1,128], index: 3, kind: output, shape index: {}]  }
   0x1   :  { %10 = vsyncpa [#allocation6], 0 }
   0x2   :  { %11 = vsyncpa [#allocation5], 0  ;;  %s188_s12 = smov [#allocation3]   ;;  %s30_s16 = sshll.u32 %s244_s1, 4  ;;  %s31_s16 = int_to_ptr.vmem [resolvable:$true] %s30_s16 }
   0x3   :  { %s17_s13 = sshll.u32 %s188_s12, 4  ;;  %s126_s19 = scalar_lea.hbm %s243_s0, 256  ;;  %s18_s13 = int_to_ptr.vmem [resolvable:$true] %s17_s13 }
   0x4   :  { %p127_p0 = scmp.ne.s32.totalorder %s243_s0, %s126_s19  ;;  %p130_p1 = scmp.lt.u32.totalorder %s126_s19, %s243_s0 }
   0x6   :  { %p132_p2 = pnand %p130_p1, %p127_p0 }
   0x8   :  { %135 = shalt.err (!%p132_p2)
}
   0x9   :  { %s136_s24 = scalar_lea.vmem %s18_s13, 256  ;;  %p141_p4 = scmp.lt.s32.totalorder %s18_s13, %s18_s13 }
   0xa   :  { %p137_p3 = scmp.ne.s32.totalorder %s18_s13, %s136_s24  ;;  %p142_p5 = scmp.lt.s32.totalorder %s136_s24, %s136_s24 }
   0xc   :  { %p143_p6 = por %p142_p5, %p141_p4 }
   0xe   :  { %p144_p7 = pnand %p143_p6, %p137_p3 }
  0x10   :  { %147 = shalt.err (!%p144_p7)
}
  0x11   :  { %s189_s1 = smov 128   ;;  %s190_s25 = smov 8  }
  0x12   :  { %23 = dma.hbm_to_vmem [thread:$0]  %s243_s0, 256, %s18_s13, [#allocation4], %s189_s1, %s189_s1, %s190_s25  }
  0x13   :  { %s148_s28 = scalar_lea.vmem %s31_s16, 16  ;;  %p153_p9 = scmp.lt.s32.totalorder %s31_s16, %s31_s16 }
  0x14   :  { %p149_p8 = scmp.ne.s32.totalorder %s31_s16, %s148_s28  ;;  %p154_p10 = scmp.lt.s32.totalorder %s148_s28, %s148_s28 }
  0x16   :  { %p155_p11 = por %p154_p10, %p153_p9 }
  0x18   :  { %p156_p12 = pnand %p155_p11, %p149_p8 }
  0x1a   :  { %159 = shalt.err (!%p156_p12)
}
  0x1b   :  { %s191_s29 = smov [#allocation7]  }
  0x1c   :  { %33 = dma.vmem_to_smem %s31_s16, 16, %s191_s29, [#allocation6]  }
  0x1d   :  { %182 = dma.done.wait [#allocation4], 256  }
  0x1e   :  { %183 = vsyncadd [#allocation4], 4294967040 }
  0x1f   :  { %184 = dma.done.wait [#allocation6], 16  }
  0x20   :  { %185 = vsyncadd [#allocation6], 4294967280 }
  0x21   :  { %42 = sfence }
  0x22   :  { %s45_s30 = sld [smem:[#allocation7]]  ;;  %s112_s4 = sld [smem:[#allocation7 + $0x1]]  ;;  %v46_v0 = vld [vmem:[#allocation3] sm:$0x1]  ;;  %v51_v1 = vld [vmem:[#allocation3 + $0x1] sm:$0x1]  ;;  %v44_v2 = vstv %s245_s2 }
  0x23   :  { %s113_s5 = sld [smem:[#allocation7 + $0x2]]  ;;  %s114_s6 = sld [smem:[#allocation7 + $0x3]]  ;;  %v56_v5 = vld [vmem:[#allocation3 + $0x2] sm:$0x1]  ;;  %v61_v9 = vld [vmem:[#allocation3 + $0x3] sm:$0x1] }
  0x24   :  { %s115_s0 = sld [smem:[#allocation7 + $0x4]]  ;;  %s116_s7 = sld [smem:[#allocation7 + $0x5]]  ;;  %v66_v13 = vld [vmem:[#allocation3 + $0x4] sm:$0x1]  ;;  %v71_v17 = vld [vmem:[#allocation3 + $0x5] sm:$0x1] }
  0x25   :  { %s117_s10 = sld [smem:[#allocation7 + $0x6]]  ;;  %s118_s11 = sld [smem:[#allocation7 + $0x7]]  ;;  %v76_v21 = vld [vmem:[#allocation3 + $0x6] sm:$0x1]  ;;  %v81_v25 = vld [vmem:[#allocation3 + $0x7] sm:$0x1] }
  0x26   :  { %s119_s12 = sld [smem:[#allocation7 + $0x8]]  ;;  %s120_s2 = sld [smem:[#allocation7 + $0x9]]  ;;  %v86_v29 = vld [vmem:[#allocation3 + $0x8] sm:$0x1]  ;;  %v91_v33 = vld [vmem:[#allocation3 + $0x9] sm:$0x1] }
  0x27   :  { %s192_s13 = smov [#allocation8]  }
  0x28   :  { %v47_v3 = vstv %s45_s30  ;;  %v52_v4 = vstv %s112_s4  ;;  %s102_s14 = sshll.u32 %s192_s13, 4  ;;  %s103_s14 = int_to_ptr.vmem [resolvable:$true] %s102_s14 }
  0x29   :  { %v48_v6 = vmul.f32 %v47_v3, %v46_v0  ;;  %v53_v7 = vmul.f32 %v52_v4, %v51_v1  ;;  %v57_v8 = vstv %s113_s5  ;;  %v62_v10 = vstv %s114_s6  ;;  %s160_s15 = scalar_lea.vmem %s103_s14, 16  ;;  %s164_s16 = scalar_lea.vmem %s103_s14, 32 }
  0x2a   :  { %v58_v12 = vmul.f32 %v57_v8, %v56_v5  ;;  %v67_v14 = vstv %s115_s0  ;;  %v63_v16 = vmul.f32 %v62_v10, %v61_v9  ;;  %v72_v18 = vstv %s116_s7  ;;  %p161_p13 = scmp.ne.s32.totalorder %s103_s14, %s160_s15  ;;  %p165_p0 = scmp.lt.s32.totalorder %s103_s14, %s103_s14 }
  0x2b   :  { %v49_v11 = vadd.f32 %v48_v6, %v44_v2  ;;  %v68_v20 = vmul.f32 %v67_v14, %v66_v13  ;;  %v77_v22 = vstv %s117_s10  ;;  %v73_v24 = vmul.f32 %v72_v18, %v71_v17  ;;  %p166_p1 = scmp.lt.s32.totalorder %s164_s16, %s160_s15 }
  0x2c   :  { %v82_v26 = vstv %s118_s11  ;;  %v78_v28 = vmul.f32 %v77_v22, %v76_v21  ;;  %v87_v30 = vstv %s119_s12  ;;  %v92_v34 = vstv %s120_s2 }
  0x2d   :  { %v54_v15 = vadd.f32 %v53_v7, %v49_v11  ;;  %v83_v32 = vmul.f32 %v82_v26, %v81_v25  ;;  %v88_v36 = vmul.f32 %v87_v30, %v86_v29  ;;  %v93_v38 = vmul.f32 %v92_v34, %v91_v33  ;;  %p167_p2 = por %p166_p1, %p165_p0 }
  0x2f   :  { %v59_v19 = vadd.f32 %v58_v12, %v54_v15  ;;  %p168_p3 = pnand %p167_p2, %p161_p13 }
  0x31   :  { %v64_v23 = vadd.f32 %v63_v16, %v59_v19 }
  0x33   :  { %v69_v27 = vadd.f32 %v68_v20, %v64_v23 }
  0x35   :  { %v74_v31 = vadd.f32 %v73_v24, %v69_v27 }
  0x37   :  { %v79_v35 = vadd.f32 %v78_v28, %v74_v31 }
  0x39   :  { %v84_v37 = vadd.f32 %v83_v32, %v79_v35 }
  0x3b   :  { %v89_v39 = vadd.f32 %v88_v36, %v84_v37 }
  0x3d   :  { %v94_v40 = vadd.f32 %v93_v38, %v89_v39 }
  0x3f   :  { %95 = vst [vmem:[#allocation8] sm:$0x1] %v94_v40 }
  0x40   :  { %171 = shalt.err (!%p168_p3)
}
  0x41   :  { %s172_s19 = scalar_lea.hbm %s246_s3, 16 }
  0x42   :  { %p173_p4 = scmp.ne.s32.totalorder %s246_s3, %s172_s19  ;;  %p176_p5 = scmp.lt.u32.totalorder %s172_s19, %s246_s3 }
  0x44   :  { %p178_p6 = pnand %p176_p5, %p173_p4 }
  0x46   :  { %181 = shalt.err (!%p178_p6)
}
  0x47   :  { %105 = dma.vmem_to_hbm [thread:$0]  %s103_s14, 16, %s246_s3, [#allocation5]  }
  0x48   :  { %186 = dma.done.wait [#allocation5], 16  }
  0x49   :  { %187 = vsyncadd [#allocation5], 4294967280 }
  0x4a   :  { %109 = vsyncpa [#allocation4], 1 }
  0x4b   :  { %110 = vsyncpa [#allocation5], 1 }
  0x4c   :  { %111 = vsyncpa [#allocation6], 1 }

</bundles_post_ra>
